<compile_context>
chip_gen: v5e
topology: v5e:2x2
jax: 0.10.0
libtpu: 0.0.40
codegen_flags: <defaults>
</compile_context>

<pallas_src>
import functools

import jax
import jax.numpy as jnp
from jax.experimental import pallas as pl
from jax.experimental.pallas import tpu as pltpu


# ----------------------------- Pallas kernel -----------------------------

def _fused_attn_kernel(x_ref, m_ref, wq_ref, wk_ref, wv_ref, wo_ref, bo_ref,
                       o_ref, acc_ref, *, use_softmax):
    # Shapes per grid step (b, h):
    #   x_ref : (1, N, D)     m_ref : (1, M, D)
    #   wq/wk/wv_ref : (1, dh, D)   (per-head slices; Wq already scaled)
    #   wo_ref: (1, dh, D)          (per-head slice of Wo^T)
    #   bo_ref: (1, D)
    #   o_ref : (1, N, D)           (accumulated over the head axis)
    #   acc_ref: (N, D) f32 scratch
    h = pl.program_id(1)

    @pl.when(h == 0)
    def _init():
        acc_ref[...] = jnp.zeros_like(acc_ref)

    # Contract the last dim of both operands -> no in-kernel transposes.
    dn = (((1,), (1,)), ((), ()))

    x = x_ref[0]                       # (N, D)
    mm = m_ref[0]                      # (M, D)

    q = jax.lax.dot_general(x, wq_ref[0], dn,
                            preferred_element_type=jnp.float32)   # (N, dh), scale folded in
    k = jax.lax.dot_general(mm, wk_ref[0], dn,
                            preferred_element_type=jnp.float32)   # (M, dh)
    v = jax.lax.dot_general(mm, wv_ref[0], dn,
                            preferred_element_type=jnp.float32)   # (M, dh)

    dots = jax.lax.dot_general(q, k, dn,
                               preferred_element_type=jnp.float32)  # (N, M)

    if use_softmax:
        mmax = jnp.max(dots, axis=-1, keepdims=True)
        e = jnp.exp(dots - mmax)
        p = e * pl.reciprocal(jnp.sum(e, axis=-1, keepdims=True), approx=True)
    else:
        p = dots

    # attn @ v, then fold this head's contribution to the output projection.
    ao = jnp.dot(p.astype(v.dtype), v,
                 preferred_element_type=jnp.float32)               # (N, dh)
    acc_ref[...] += jnp.dot(ao, wo_ref[0],
                            preferred_element_type=jnp.float32)    # (N, D)

    @pl.when(h == pl.num_programs(1) - 1)
    def _finalize():
        o_ref[0] = (acc_ref[...] + bo_ref[...]).astype(o_ref.dtype)


# ----------------------------- wrapper -----------------------------

def _fused_attention(x, m, wq_h, wk_h, wv_h, wo_h, bo_2d, *, use_softmax):
    """Fully fused projections + attention + output projection.

    x: (B, N, D), m: (B, M, D)
    wq_h/wk_h/wv_h: (H, dh, D) per-head nn.Linear weights (wq pre-scaled)
    wo_h: (H, dh, D) per-head slices of Wo^T
    bo_2d: (1, D)
    returns: (B, N, D)
    """
    B, N, D = x.shape
    M = m.shape[1]
    H, dh, _ = wq_h.shape

    kern = functools.partial(_fused_attn_kernel, use_softmax=use_softmax)
    return pl.pallas_call(
        kern,
        out_shape=jax.ShapeDtypeStruct((B, N, D), x.dtype),
        grid_spec=pltpu.PrefetchScalarGridSpec(
            num_scalar_prefetch=0,
            grid=(B, H),
            in_specs=[
                pl.BlockSpec((1, N, D), lambda b, h: (b, 0, 0)),    # x (reused over h)
                pl.BlockSpec((1, M, D), lambda b, h: (b, 0, 0)),    # m (reused over h)
                pl.BlockSpec((1, dh, D), lambda b, h: (h, 0, 0)),   # Wq (scaled), head h
                pl.BlockSpec((1, dh, D), lambda b, h: (h, 0, 0)),   # Wk, head h
                pl.BlockSpec((1, dh, D), lambda b, h: (h, 0, 0)),   # Wv, head h
                pl.BlockSpec((1, dh, D), lambda b, h: (h, 0, 0)),   # Wo^T, head h
                pl.BlockSpec((1, D), lambda b, h: (0, 0)),          # bias
            ],
            out_specs=pl.BlockSpec((1, N, D), lambda b, h: (b, 0, 0)),
            scratch_shapes=[pltpu.VMEM((N, D), jnp.float32)],
        ),
        compiler_params=pltpu.CompilerParams(
            dimension_semantics=("parallel", "arbitrary")),
    )(x, m, wq_h, wk_h, wv_h, wo_h, bo_2d)


class AttentionPallas:
    """Pallas/JAX equivalent of the PyTorch Attention module (mask=None path)."""

    def __init__(self, dim, heads=8, dim_head=64, softmax=True, key=None):
        inner_dim = dim_head * heads
        self.dim = dim
        self.heads = heads
        self.dim_head = dim_head
        self.scale = dim ** (-0.5)        # note: dim, not dim_head (matches PyTorch src)
        self.softmax = softmax

        key = jax.random.PRNGKey(0) if key is None else key
        kq, kk, kv, ko, kb = jax.random.split(key, 5)
        # nn.Linear weights are (out_features, in_features); deterministic init.
        s_in = 1.0 / (dim ** 0.5)
        s_inner = 1.0 / (inner_dim ** 0.5)
        self.w_q = jax.random.uniform(kq, (inner_dim, dim), jnp.float32, -s_in, s_in)
        self.w_k = jax.random.uniform(kk, (inner_dim, dim), jnp.float32, -s_in, s_in)
        self.w_v = jax.random.uniform(kv, (inner_dim, dim), jnp.float32, -s_in, s_in)
        self.w_o = jax.random.uniform(ko, (dim, inner_dim), jnp.float32, -s_inner, s_inner)
        self.b_o = jax.random.uniform(kb, (dim,), jnp.float32, -s_inner, s_inner)

        # One-time host-side pre-packing for the fused kernel (free reshapes +
        # a single tiny transpose of Wo; never done per forward call):
        #   * scale folded into Wq
        #   * all weights split per head as (H, dh, D)
        #   * Wo stored pre-transposed so the kernel needs no `.T`
        H, dh = heads, dim_head
        self.w_q_h = (self.w_q * self.scale).reshape(H, dh, dim)
        self.w_k_h = self.w_k.reshape(H, dh, dim)
        self.w_v_h = self.w_v.reshape(H, dh, dim)
        self.w_o_h = self.w_o.T.reshape(H, dh, dim)      # (H, dh, D)
        self.b_o_2d = self.b_o.reshape(1, dim)

    def __call__(self, x, m, mask=None):
        if mask is not None:
            # TODO(synk): mask path (padding + outer-product + masked_fill) not implemented.
            raise NotImplementedError("mask path not implemented")
        return _fused_attention(
            x, m,
            self.w_q_h, self.w_k_h, self.w_v_h, self.w_o_h, self.b_o_2d,
            use_softmax=self.softmax)


def _reference(attn, x, m):
    """Plain-JAX reference (mirrors the PyTorch forward) for numerical check."""
    B, N, D = x.shape
    M = m.shape[1]
    H, dh = attn.heads, attn.dim_head
    q = x @ attn.w_q.T
    k = m @ attn.w_k.T
    v = m @ attn.w_v.T
    q = q.reshape(B, N, H, dh).transpose(0, 2, 1, 3)
    k = k.reshape(B, M, H, dh).transpose(0, 2, 1, 3)
    v = v.reshape(B, M, H, dh).transpose(0, 2, 1, 3)
    dots = jnp.einsum("bhnd,bhmd->bhnm", q, k) * attn.scale
    p = jax.nn.softmax(dots, axis=-1) if attn.softmax else dots
    o = jnp.einsum("bhnm,bhmd->bhnd", p, v)
    o = o.transpose(0, 2, 1, 3).reshape(B, N, H * dh)
    return o @ attn.w_o.T + attn.b_o


if __name__ == "__main__":
    key = jax.random.PRNGKey(0)
    kx, km, kp = jax.random.split(key, 3)

    B, N, M, dim = 2, 8, 8, 32
    heads, dim_head = 4, 16

    x = jax.random.normal(kx, (B, N, dim), jnp.float32)
    m = jax.random.normal(km, (B, M, dim), jnp.float32)

    attn = AttentionPallas(dim, heads=heads, dim_head=dim_head, softmax=True, key=kp)

    out = attn(x, m)
    out = jax.block_until_ready(out)

    ref = _reference(attn, x, m)
    assert out.shape == (B, N, dim)
    # Tolerance accounts for the EUP approximate-reciprocal softmax divide.
    assert jnp.allclose(out, ref, atol=1e-2, rtol=1e-2), "mismatch vs. reference"

    print("KERNEL_OK")
</pallas_src>

<mosaic_0001>
module attributes {stable_mosaic.version = 11 : i64} {
  func.func @_fused_attn_kernel(%arg0: i32, %arg1: i32, %arg2: memref<1x8x32xf32, #tpu.memory_space<vmem>>, %arg3: memref<1x8x32xf32, #tpu.memory_space<vmem>>, %arg4: memref<1x16x32xf32, #tpu.memory_space<vmem>>, %arg5: memref<1x16x32xf32, #tpu.memory_space<vmem>>, %arg6: memref<1x16x32xf32, #tpu.memory_space<vmem>>, %arg7: memref<1x16x32xf32, #tpu.memory_space<vmem>>, %arg8: memref<1x32xf32, #tpu.memory_space<vmem>>, %arg9: memref<1x8x32xf32, #tpu.memory_space<vmem>>, %arg10: memref<8x32xf32, #tpu.memory_space<vmem>>) attributes {dimension_semantics = [#tpu.dimension_semantics<parallel>, #tpu.dimension_semantics<arbitrary>], iteration_bounds = array<i64: 2, 4>, scalar_prefetch = 0 : i64, scratch_operands = 1 : i64, tpu.core_type = #tpu.core_type<tc>, window_params = [{transform_indices = @transform_0, window_bounds = array<i64: 1, 8, 32>}, {transform_indices = @transform_1, window_bounds = array<i64: 1, 8, 32>}, {transform_indices = @transform_2, window_bounds = array<i64: 1, 16, 32>}, {transform_indices = @transform_3, window_bounds = array<i64: 1, 16, 32>}, {transform_indices = @transform_4, window_bounds = array<i64: 1, 16, 32>}, {transform_indices = @transform_5, window_bounds = array<i64: 1, 16, 32>}, {pipeline_mode = #tpu.pipeline_mode<synchronous>, transform_indices = @transform_6, window_bounds = array<i64: 1, 32>}, {transform_indices = @transform_7, window_bounds = array<i64: 1, 8, 32>}]} {
    %c0_i32 = arith.constant 0 : i32
    %0 = arith.cmpi eq, %arg1, %c0_i32 : i32
    %1 = arith.extui %0 : i1 to i32
    %c0_i32_0 = arith.constant 0 : i32
    %2 = arith.cmpi ne, %1, %c0_i32_0 : i32
    scf.if %2 {
      %cst_30 = arith.constant 0.000000e+00 : f32
      %37 = vector.broadcast %cst_30 : f32 to vector<8x32xf32>
      %c0_31 = arith.constant 0 : index
      %c0_32 = arith.constant 0 : index
      %38 = vector.load %arg10[%c0_31, %c0_32] : memref<8x32xf32, #tpu.memory_space<vmem>>, vector<8x32xf32>
      tpu.vector_store %arg10[%c0_31, %c0_32], %37 {strides = array<i32>} : memref<8x32xf32, #tpu.memory_space<vmem>>, vector<8x32xf32>,
    } else {
    }
    %c0 = arith.constant 0 : index
    %c0_1 = arith.constant 0 : index
    %c0_2 = arith.constant 0 : index
    %3 = vector.load %arg2[%c0, %c0_1, %c0_2] : memref<1x8x32xf32, #tpu.memory_space<vmem>>, vector<1x8x32xf32>
    %4 = vector.shape_cast %3 : vector<1x8x32xf32> to vector<8x32xf32>
    %c0_3 = arith.constant 0 : index
    %c0_4 = arith.constant 0 : index
    %c0_5 = arith.constant 0 : index
    %5 = vector.load %arg3[%c0_3, %c0_4, %c0_5] : memref<1x8x32xf32, #tpu.memory_space<vmem>>, vector<1x8x32xf32>
    %6 = vector.shape_cast %5 : vector<1x8x32xf32> to vector<8x32xf32>
    %c0_6 = arith.constant 0 : index
    %c0_7 = arith.constant 0 : index
    %c0_8 = arith.constant 0 : index
    %7 = vector.load %arg4[%c0_6, %c0_7, %c0_8] : memref<1x16x32xf32, #tpu.memory_space<vmem>>, vector<1x16x32xf32>
    %8 = vector.shape_cast %7 : vector<1x16x32xf32> to vector<16x32xf32>
    %cst = arith.constant dense<0.000000e+00> : vector<8x16xf32>
    %9 = tpu.matmul %4, %8, %cst {dimension_numbers = #tpu.dot_dimension_numbers<[1], [1], [0], [0], [0, 0, 1, 0], [], []>} : vector<8x32xf32>, vector<16x32xf32>, vector<8x16xf32> -> vector<8x16xf32>
    %c0_9 = arith.constant 0 : index
    %c0_10 = arith.constant 0 : index
    %c0_11 = arith.constant 0 : index
    %10 = vector.load %arg5[%c0_9, %c0_10, %c0_11] : memref<1x16x32xf32, #tpu.memory_space<vmem>>, vector<1x16x32xf32>
    %11 = vector.shape_cast %10 : vector<1x16x32xf32> to vector<16x32xf32>
    %cst_12 = arith.constant dense<0.000000e+00> : vector<8x16xf32>
    %12 = tpu.matmul %6, %11, %cst_12 {dimension_numbers = #tpu.dot_dimension_numbers<[1], [1], [0], [0], [0, 0, 1, 0], [], []>} : vector<8x32xf32>, vector<16x32xf32>, vector<8x16xf32> -> vector<8x16xf32>
    %c0_13 = arith.constant 0 : index
    %c0_14 = arith.constant 0 : index
    %c0_15 = arith.constant 0 : index
    %13 = vector.load %arg6[%c0_13, %c0_14, %c0_15] : memref<1x16x32xf32, #tpu.memory_space<vmem>>, vector<1x16x32xf32>
    %14 = vector.shape_cast %13 : vector<1x16x32xf32> to vector<16x32xf32>
    %cst_16 = arith.constant dense<0.000000e+00> : vector<8x16xf32>
    %15 = tpu.matmul %6, %14, %cst_16 {dimension_numbers = #tpu.dot_dimension_numbers<[1], [1], [0], [0], [0, 0, 1, 0], [], []>} : vector<8x32xf32>, vector<16x32xf32>, vector<8x16xf32> -> vector<8x16xf32>
    %cst_17 = arith.constant dense<0.000000e+00> : vector<8x8xf32>
    %16 = tpu.matmul %9, %12, %cst_17 {dimension_numbers = #tpu.dot_dimension_numbers<[1], [1], [0], [0], [0, 0, 1, 0], [], []>} : vector<8x16xf32>, vector<8x16xf32>, vector<8x8xf32> -> vector<8x8xf32>
    %cst_18 = arith.constant dense<0xFF800000> : vector<8xf32>
    %17 = vector.multi_reduction <maximumf>, %16, %cst_18 [1] : vector<8x8xf32> to vector<8xf32>
    %18 = vector.shape_cast %17 : vector<8xf32> to vector<8x1xf32>
    %19 = vector.broadcast %18 : vector<8x1xf32> to vector<8x8xf32>
    %20 = arith.subf %16, %19 : vector<8x8xf32>
    %21 = math.exp %20 : vector<8x8xf32>
    %cst_19 = arith.constant dense<0.000000e+00> : vector<8xf32>
    %22 = vector.multi_reduction <add>, %21, %cst_19 [1] : vector<8x8xf32> to vector<8xf32>
    %23 = vector.shape_cast %22 : vector<8xf32> to vector<8x1xf32>
    %24 = tpu.reciprocal %23 {approx = true} : vector<8x1xf32> -> vector<8x1xf32>
    %25 = vector.broadcast %24 : vector<8x1xf32> to vector<8x8xf32>
    %26 = arith.mulf %21, %25 : vector<8x8xf32>
    %cst_20 = arith.constant dense<0.000000e+00> : vector<8x16xf32>
    %27 = tpu.matmul %26, %15, %cst_20 {dimension_numbers = #tpu.dot_dimension_numbers<[1], [0], [0], [1], [0, 0, 1, 1], [], []>} : vector<8x8xf32>, vector<8x16xf32>, vector<8x16xf32> -> vector<8x16xf32>
    %c0_21 = arith.constant 0 : index
    %c0_22 = arith.constant 0 : index
    %28 = vector.load %arg10[%c0_21, %c0_22] : memref<8x32xf32, #tpu.memory_space<vmem>>, vector<8x32xf32>
    %c0_23 = arith.constant 0 : index
    %c0_24 = arith.constant 0 : index
    %c0_25 = arith.constant 0 : index
    %29 = vector.load %arg7[%c0_23, %c0_24, %c0_25] : memref<1x16x32xf32, #tpu.memory_space<vmem>>, vector<1x16x32xf32>
    %30 = vector.shape_cast %29 : vector<1x16x32xf32> to vector<16x32xf32>
    %cst_26 = arith.constant dense<0.000000e+00> : vector<8x32xf32>
    %31 = tpu.matmul %27, %30, %cst_26 {dimension_numbers = #tpu.dot_dimension_numbers<[1], [0], [0], [1], [0, 0, 1, 1], [], []>} : vector<8x16xf32>, vector<16x32xf32>, vector<8x32xf32> -> vector<8x32xf32>
    %32 = arith.addf %28, %31 : vector<8x32xf32>
    %c0_27 = arith.constant 0 : index
    %c0_28 = arith.constant 0 : index
    %33 = vector.load %arg10[%c0_27, %c0_28] : memref<8x32xf32, #tpu.memory_space<vmem>>, vector<8x32xf32>
    tpu.vector_store %arg10[%c0_27, %c0_28], %32 {strides = array<i32>} : memref<8x32xf32, #tpu.memory_space<vmem>>, vector<8x32xf32>,
    %c3_i32 = arith.constant 3 : i32
    %34 = arith.cmpi eq, %arg1, %c3_i32 : i32
    %35 = arith.extui %34 : i1 to i32
    %c0_i32_29 = arith.constant 0 : i32
    %36 = arith.cmpi ne, %35, %c0_i32_29 : i32
    scf.if %36 {
      %c0_30 = arith.constant 0 : index
      %c0_31 = arith.constant 0 : index
      %37 = vector.load %arg10[%c0_30, %c0_31] : memref<8x32xf32, #tpu.memory_space<vmem>>, vector<8x32xf32>
      %c0_32 = arith.constant 0 : index
      %c0_33 = arith.constant 0 : index
      %38 = vector.load %arg8[%c0_32, %c0_33] : memref<1x32xf32, #tpu.memory_space<vmem>>, vector<1x32xf32>
      %39 = vector.broadcast %38 : vector<1x32xf32> to vector<8x32xf32>
      %40 = arith.addf %37, %39 : vector<8x32xf32>
      %c0_34 = arith.constant 0 : index
      %c0_35 = arith.constant 0 : index
      %c0_36 = arith.constant 0 : index
      %41 = vector.load %arg9[%c0_34, %c0_35, %c0_36] : memref<1x8x32xf32, #tpu.memory_space<vmem>>, vector<1x8x32xf32>
      %42 = vector.shape_cast %41 : vector<1x8x32xf32> to vector<8x32xf32>
      %43 = vector.shape_cast %40 : vector<8x32xf32> to vector<1x8x32xf32>
      tpu.vector_store %arg9[%c0_34, %c0_35, %c0_36], %43 {strides = array<i32>} : memref<1x8x32xf32, #tpu.memory_space<vmem>>, vector<1x8x32xf32>,
    } else {
    }
    return
  }
  func.func @transform_0(%arg0: i32, %arg1: i32) -> (i32, i32, i32) {
    %c0_i32 = arith.constant 0 : i32
    %c0_i32_0 = arith.constant 0 : i32
    %c0_i32_1 = arith.constant 0 : i32
    return %arg0, %c0_i32, %c0_i32_0 : i32, i32, i32
  }
  func.func @transform_1(%arg0: i32, %arg1: i32) -> (i32, i32, i32) {
    %c0_i32 = arith.constant 0 : i32
    %c0_i32_0 = arith.constant 0 : i32
    %c0_i32_1 = arith.constant 0 : i32
    return %arg0, %c0_i32, %c0_i32_0 : i32, i32, i32
  }
  func.func @transform_2(%arg0: i32, %arg1: i32) -> (i32, i32, i32) {
    %c0_i32 = arith.constant 0 : i32
    %c0_i32_0 = arith.constant 0 : i32
    %c0_i32_1 = arith.constant 0 : i32
    return %arg1, %c0_i32, %c0_i32_0 : i32, i32, i32
  }
  func.func @transform_3(%arg0: i32, %arg1: i32) -> (i32, i32, i32) {
    %c0_i32 = arith.constant 0 : i32
    %c0_i32_0 = arith.constant 0 : i32
    %c0_i32_1 = arith.constant 0 : i32
    return %arg1, %c0_i32, %c0_i32_0 : i32, i32, i32
  }
  func.func @transform_4(%arg0: i32, %arg1: i32) -> (i32, i32, i32) {
    %c0_i32 = arith.constant 0 : i32
    %c0_i32_0 = arith.constant 0 : i32
    %c0_i32_1 = arith.constant 0 : i32
    return %arg1, %c0_i32, %c0_i32_0 : i32, i32, i32
  }
  func.func @transform_5(%arg0: i32, %arg1: i32) -> (i32, i32, i32) {
    %c0_i32 = arith.constant 0 : i32
    %c0_i32_0 = arith.constant 0 : i32
    %c0_i32_1 = arith.constant 0 : i32
    return %arg1, %c0_i32, %c0_i32_0 : i32, i32, i32
  }
  func.func @transform_6(%arg0: i32, %arg1: i32) -> (i32, i32) {
    %c0_i32 = arith.constant 0 : i32
    %c0_i32_0 = arith.constant 0 : i32
    %c0_i32_1 = arith.constant 0 : i32
    return %c0_i32, %c0_i32_0 : i32, i32
  }
  func.func @transform_7(%arg0: i32, %arg1: i32) -> (i32, i32, i32) {
    %c0_i32 = arith.constant 0 : i32
    %c0_i32_0 = arith.constant 0 : i32
    %c0_i32_1 = arith.constant 0 : i32
    return %arg0, %c0_i32, %c0_i32_0 : i32, i32, i32
  }
}

</mosaic_0001>

<bundles_post_ra>
// kernel: tpu_custom_call.1
= control target key start
LH: loop header
LB: loop body
LE: loop exit
PB: predicated region body
PF: predicated region fallthrough
CT: control target
= control target key end

     0   :  { %s1833_s0 = inlined_call_operand.hbm [shape: f32[2,8,32], index: 0, kind: input, shape index: {}]   ;;  %s1834_s1 = inlined_call_operand.hbm [shape: f32[2,8,32], index: 1, kind: input, shape index: {}]   ;;  %s1835_s2 = inlined_call_operand.hbm [shape: f32[4,16,32], index: 2, kind: input, shape index: {}]   ;;  %s1836_s3 = inlined_call_operand.hbm [shape: f32[4,16,32], index: 3, kind: input, shape index: {}]   ;;  %s1837_s4 = inlined_call_operand.hbm [shape: f32[4,16,32], index: 4, kind: input, shape index: {}]   ;;  %s1838_s5 = inlined_call_operand.hbm [shape: f32[4,16,32], index: 5, kind: input, shape index: {}]   ;;  %s1839_s6 = inlined_call_operand.vmem [shape: f32[1,32], index: 6, kind: input, shape index: {}]   ;;  %s1840_s7 = inlined_call_operand.hbm [shape: f32[2,8,32], index: 7, kind: output, shape index: {}]  }
   0x1   :  { %1860 = sst [smem:[#allocation34_spill]] %s1834_s1 }
   0x2   :  { %1861 = sst [smem:[#allocation35_spill]] %s1836_s3 }
   0x3   :  { %1862 = sst [smem:[#allocation36_spill]] %s1839_s6 }
   0x4   :  { %1863 = sst [smem:[#allocation37_spill]] %s1840_s7 }
   0x5   :  { %12 = vsyncpa [#allocation4], 0 }
   0x6   :  { %14 = vsyncpa [#allocation4 + $0x1], 0 }
   0x7   :  { %15 = vsyncpa [#allocation7], 0 }
   0x8   :  { %17 = vsyncpa [#allocation7 + $0x1], 0 }
   0x9   :  { %18 = vsyncpa [#allocation10], 0 }
   0xa   :  { %20 = vsyncpa [#allocation10 + $0x1], 0 }
   0xb   :  { %21 = vsyncpa [#allocation13], 0 }
   0xc   :  { %23 = vsyncpa [#allocation13 + $0x1], 0 }
   0xd   :  { %24 = vsyncpa [#allocation5], 0 }
   0xe   :  { %26 = vsyncpa [#allocation5 + $0x1], 0  ;;  %s1464_s24 = smov 0   ;;  %s1466_s25 = smov 0  }
   0xf   :  { %s1468_s26 = smov 0   ;;  %s1470_s27 = smov 0  }
  0x10   :  { %s1472_s28 = smov 0   ;;  %s1474_s29 = smov 0  }
  0x11   :  { %s1476_s30 = smov 0   ;;  %s1478_s8 = smov 0  }
  0x12   :  { %s1480_s9 = smov 0   ;;  %s1482_s10 = smov 0  }
  0x13   :  { %s1484_s11 = smov 0  }
  0x14 LB: > { %1864 = sst [smem:[#allocation21_spill]] %s1383_s25  ;;  %s1520_s12 = sadd.s32 4294967295, %s1419_s11   ;;  %s1419_s11 = sphi %s1484_s11, %s32_s11   ;;  %s1415_s10 = sphi %s1482_s10, %s1916_s10   ;;  %s1411_s9 = sphi %s1480_s9, %s1908_s9   ;;  %s1407_s8 = sphi %s1478_s8, %s1915_s8   ;;  %s1403_s30 = sphi %s1476_s30, %s1907_s30   ;;  %s1399_s29 = sphi %s1474_s29, %s1914_s29   ;;  %s1395_s28 = sphi %s1472_s28, %s1913_s28   ;;  %s1391_s27 = sphi %s1470_s27, %s1912_s27   ;;  %s1387_s26 = sphi %s1468_s26, %s1911_s26   ;;  %s1383_s25 = sphi %s1466_s25, %s1910_s25   ;;  %s1379_s24 = sphi %s1464_s24, %s1904_s24  }
  0x15   : > { %1865 = sst [smem:[#allocation22_spill]] %s1391_s27  ;;  %s916_s13 = sadd.s32 4294967294, %s1419_s11  }
  0x16   : > { %1866 = sst [smem:[#allocation23_spill]] %s1403_s30  ;;  %s41_s14 = sadd.s32 1, %s1411_s9 }
  0x17   : > { %1867 = sst [smem:[#allocation24_spill]] %s1407_s8  ;;  %s44_s15 = sadd.s32 1, %s1415_s10 }
  0x18   : > { %1868 = sst [smem:[#allocation25_spill]] %s1411_s9  ;;  %p42_p0 = scmp.ge.s32.totalorder %s41_s14, 4 }
  0x19   : > { %1869 = sst [smem:[#allocation26_spill]] %s1419_s11  ;;  %s51_s16 = sadd.s32 1, %s1399_s29 }
  0x1a   : > { %p58_p1 = scmp.ne.s32.totalorder %s1399_s29, %s1395_s28  ;;  %p59_p2 = scmp.eq.s32.totalorder %s1419_s11, 0 }
  0x1b   : > { %s1918_s14 = smov (%p42_p0, %s41_s14), 0  ;;  %s1920_s15 = smov (!%p42_p0, %s44_s15), %s1415_s10 }
  0x1c   : > { %1870 = sst [smem:[#allocation27_spill]] %s1918_s14  ;;  %p1537_p3 = por %p59_p2, %p58_p1 }
  0x1d   : > { %p1842_p4 = scmp.ne.s32.totalorder %s1395_s28, %s1391_s27  ;;  %p46_p5 = scmp.ge.s32.totalorder %s1920_s15, 2 }
  0x1e   : > { %p65_p6 = scmp.eq.s32.totalorder %s1520_s12, 0  ;;  %s100_s18 = ssub.s32 %s1411_s9, %s1918_s14 }
  0x1f   : > { %s103_s19 = sadd.s32 1, %s1387_s26  ;;  %s1922_s15 = smov (%p46_p5, %s1920_s15), 0 }
  0x20   : > { %1872 = sst [smem:[#allocation28_spill]] %s1922_s15  ;;  %p1554_p7 = por %p65_p6, %p1842_p4 }
  0x21   : > { %p101_p8 = scmp.eq.s32.totalorder %s100_s18, 0  ;;  %s48_s21 = ssub.s32 %s1415_s10, %s1922_s15 }
  0x22   : > { %p110_p9 = scmp.ne.s32.totalorder %s1387_s26, %s1383_s25  ;;  %p49_p10 = scmp.eq.s32.totalorder %s48_s21, 0 }
  0x23   : > { %p116_p11 = scmp.ne.s32.totalorder %s1383_s25, %s1379_s24  ;;  %p239_p0 = scmp.eq.s32.totalorder %s1520_s12, 7 }
  0x24   : > { %s1565_s22 = scalar_select %p101_p8, %s1387_s26, %s103_s19  }
  0x25   : > { %s1568_s23 = scalar_select %p49_p10, %s1399_s29, %s51_s16  }
  0x26   : > { %1874 = sst [smem:[#allocation29_spill]] %s1565_s22  ;;  %p1572_p12 = por %p110_p9, %p59_p2 }
  0x27   : > { %1875 = sst [smem:[#allocation30_spill]] %s1568_s23  ;;  %p1578_p13 = por %p116_p11, %p65_p6 }
  0x28   : > { %p245_p5 = scmp.eq.s32.totalorder %s916_s13, 7  ;;  %p1003_p4 = scmp.lt.s32.totalorder %s1419_s11, 8 }
  0x29   : > { %s1877_s18 = scalar_select %p1578_p13, 1, 0 }
  0x2a   : > { %p1587_p8 = por %p239_p0, %p58_p1  ;;  %p1881_p10 = scmp.ne.s32.totalorder %s1395_s28, %s1391_s27 }
  0x2b   : > { %1878 = sst [smem:[#allocation31_spill]] %s1877_s18  ;;  %s1849_s19 = sand.u32 1, %s1399_s29  }
  0x2c   : > { %s1879_s24 = scalar_select %p1587_p8, 1, 0 }
  0x2d   : > { %p1594_p2 = por %p245_p5, %p1881_p10  ;;  %s1850_s21 = sshll.u32 %s1415_s10, 3 }
  0x2e   : > { %1880 = sst [smem:[#allocation32_spill]] %s1879_s24  ;;  %s1602_s15 = sshll.u32 %s1849_s19, 3 }
  0x2f   : > { %s1882_s16 = scalar_select %p1594_p2, 1, 0 }
  0x30   : > { %p1608_p1 = pnand %p1003_p4, %p1537_p3  ;;  %s287_s23 = sand.u32 1, %s1419_s11  }
  0x31   : > { %1883 = sst [smem:[#allocation33_spill]] %s1882_s16  ;;  %s291_s7 = scalar_lea.vmem [#allocation6], %s1602_s15 }
  0x32   : > { %s1885_s1 = sld [smem:[#allocation34_spill]]  ;;  %s299_s24 = sshll.u32 %s291_s7, 4  ;;  %s300_s24 = int_to_ptr.vmem [resolvable:$true] %s299_s24 }
  0x33   : > { %p1623_p6 = pnand %p1003_p4, %p1572_p12  ;;  %s1627_s19 = scalar_lea.sflag [#allocation7], %s287_s23 }
  0x34   : > { %p935_p3 = scmp.ge.s32.totalorder %s1419_s11, 1  ;;  %p392_p9 = scmp.lt.s32.totalorder %s1419_s11, 9 }
  0x35   : > { %s1854_s7 = sand.u32 1, %s1387_s26   ;;  %s1888_s3 = sld [smem:[#allocation35_spill]] }
  0x36   : > { %p1638_p11 = pnand %p935_p3, %p392_p9  ;;  %s1644_s22 = sshll.u32 %s1854_s7, 4 }
  0x37   : > { %s1651_s11 = scalar_lea.sflag [#allocation10], %s287_s23  ;;  %s1858_s6 = smov 128  }
  0x38   : > { %s295_s27 = scalar_lea.hbm %s1885_s1, %s1850_s21  ;;  %s332_s1 = scalar_lea.vmem [#allocation9], %s1644_s22 }
  0x39   : > { %s297_s8 = sshll.u32 %s295_s27, 4  ;;  %s1636_s27 = sshll.u32 %s1411_s9, 4  ;;  %s298_s8 = int_to_ptr.hbm [resolvable:$true] %s297_s8 }
  0x3a   : > { %986 = dma.hbm_to_vmem [thread:$0]  (!%p1608_p1), %s298_s8, 128, %s300_s24, %s1627_s19  }
  0x3b   : > { %s337_s8 = scalar_lea.hbm %s1888_s3, %s1636_s27  ;;  %s340_s9 = sshll.u32 %s332_s1, 4  ;;  %s341_s9 = int_to_ptr.vmem [resolvable:$true] %s340_s9 }
  0x3c   : > { %s338_s24 = sshll.u32 %s337_s8, 4  ;;  %s1422_s7 = smov 8   ;;  %s339_s24 = int_to_ptr.hbm [resolvable:$true] %s338_s24 }
  0x3d   : > { %992 = dma.hbm_to_vmem [thread:$0]  (!%p1623_p6), %s339_s24, 256, %s341_s9, %s1651_s11, %s1858_s6, %s1858_s6, %s1422_s7  }
  0x3e   : > { %s1889_s21 = sshll.u32 %s1415_s10, 3  ;;  %s272_s3 = scalar_lea.vmem [#allocation3], %s1602_s15 }
  0x3f   : > { %s276_s1 = scalar_lea.hbm %s1833_s0, %s1889_s21  ;;  %s280_s23 = sshll.u32 %s272_s3, 4  ;;  %s281_s23 = int_to_ptr.vmem [resolvable:$true] %s280_s23 }
  0x40   : > { %s278_s30 = sshll.u32 %s276_s1, 4  ;;  %s1890_s18 = sand.u32 1, %s1399_s29   ;;  %s279_s30 = int_to_ptr.hbm [resolvable:$true] %s278_s30 }
  0x41   : > { %s269_s25 = scalar_lea.sflag [#allocation4], %s1890_s18  ;;  %s315_s6 = scalar_lea.hbm %s1835_s2, %s1636_s27 }
  0x42   : > { %983 = dma.hbm_to_vmem [thread:$0]  (!%p1608_p1), %s279_s30, 128, %s281_s23, %s269_s25  }
  0x43   : > { %s310_s16 = scalar_lea.vmem [#allocation8], %s1644_s22  ;;  %s316_s8 = sshll.u32 %s315_s6, 4  ;;  %s317_s8 = int_to_ptr.hbm [resolvable:$true] %s316_s8 }
  0x44   : > { %s318_s21 = sshll.u32 %s310_s16, 4  ;;  %s1891_s3 = smov 128   ;;  %s319_s21 = int_to_ptr.vmem [resolvable:$true] %s318_s21 }
  0x45   : > { %989 = dma.hbm_to_vmem [thread:$0]  (!%p1623_p6), %s317_s8, 256, %s319_s21, %s1627_s19, %s1891_s3, %s1891_s3, %s1422_s7  }
  0x46   : > { %s359_s25 = scalar_lea.hbm %s1837_s4, %s1636_s27  ;;  %s354_s30 = scalar_lea.vmem [#allocation11], %s1644_s22 }
  0x47   : > { %s362_s13 = sshll.u32 %s354_s30, 4  ;;  %s360_s1 = sshll.u32 %s359_s25, 4  ;;  %s363_s13 = int_to_ptr.vmem [resolvable:$true] %s362_s13  ;;  %s361_s1 = int_to_ptr.hbm [resolvable:$true] %s360_s1 }
  0x48   : > { %995 = dma.hbm_to_vmem [thread:$0]  (!%p1623_p6), %s361_s1, 256, %s363_s13, %s1651_s11, %s1891_s3, %s1891_s3, %s1422_s7  }
  0x49   : > { %s381_s9 = scalar_lea.hbm %s1838_s5, %s1636_s27  ;;  %s376_s19 = scalar_lea.vmem [#allocation12], %s1644_s22 }
  0x4a   : > { %s382_s24 = sshll.u32 %s381_s9, 4  ;;  %s384_s16 = sshll.u32 %s376_s19, 4  ;;  %s383_s24 = int_to_ptr.hbm [resolvable:$true] %s382_s24  ;;  %s385_s16 = int_to_ptr.vmem [resolvable:$true] %s384_s16 }
  0x4b   : > { %s1892_s21 = sand.u32 1, %s1387_s26   ;;  %396 = sbr.rel (%p1638_p11) target bundleno = 929 (0x3a1), region = 48 }
  0x4c   : > { %s373_s8 = scalar_lea.sflag [#allocation13], %s1892_s21  ;;  %s1706_s11 = sand.u32 (!%p1638_p11), 1, %s1395_s28  }
  0x4d   : > { %998 = dma.hbm_to_vmem [thread:$0]  (!%p1623_p6), %s383_s24, 256, %s385_s16, %s373_s8, %s1891_s3, %s1891_s3, %s1422_s7  }
  0x4e   : > { %s1709_s27 = sshll.u32 (!%p1638_p11), %s1706_s11, 3  ;;  %s399_s22 = scalar_lea.sflag (!%p1638_p11), [#allocation4], %s1706_s11 }
  0x4f   : > { %s402_s15 = scalar_lea.vmem (!%p1638_p11), [#allocation3], %s1709_s27 }
  0x50   : > { %1354 = dma.done.wait (%p1554_p7), %s399_s22, 128  }
  0x51   : > { %1356 = vsyncadd (%p1554_p7), %s399_s22, 4294967168  ;;  %s408_s17 = sand.u32 1, %s1520_s12   ;;  %s412_s14 = scalar_lea.vmem [#allocation6], %s1709_s27 }
  0x52   : > { %s409_s7 = scalar_lea.sflag [#allocation7], %s408_s17 }
  0x53   : > { %1358 = dma.done.wait (%p1554_p7), %s409_s7, 128  }
  0x54   : > { %1360 = vsyncadd (%p1554_p7), %s409_s7, 4294967168  ;;  %s1893_s3 = sld [smem:[#allocation21_spill]] }
  0x5a   : > { %s420_s25 = sand.u32 1, %s1893_s3  }
  0x5b   : > { %s1724_s30 = sshll.u32 %s420_s25, 4 }
  0x5c   : > { %s422_s13 = scalar_lea.vmem [#allocation8], %s1724_s30 }
  0x5d   : > { %1362 = dma.done.wait (%p1578_p13), %s409_s7, 256  }
  0x5e   : > { %1364 = vsyncadd (%p1578_p13), %s409_s7, 4294967040  ;;  %s429_s12 = scalar_lea.sflag [#allocation10], %s408_s17  ;;  %s432_s1 = scalar_lea.vmem [#allocation9], %s1724_s30 }
  0x5f   : > { %1366 = dma.done.wait (%p1578_p13), %s429_s12, 512  }
  0x60   : > { %1368 = vsyncadd (%p1578_p13), %s429_s12, 4294966784  ;;  %s442_s20 = scalar_lea.vmem [#allocation11], %s1724_s30  ;;  %s449_s6 = scalar_lea.sflag [#allocation13], %s420_s25 }
  0x61   : > { %s452_s23 = scalar_lea.vmem [#allocation12], %s1724_s30 }
  0x62   : > { %1370 = dma.done.wait (%p1578_p13), %s449_s6, 256  }
  0x63   : > { %1372 = vsyncadd (%p1578_p13), %s449_s6, 4294967040  ;;  %s508_s9 = scalar_lea.vmem [#allocation14], %s1709_s27  ;;  %s1895_s24 = sld [smem:[#allocation23_spill]] }
  0x69   : > { %p943_p4 = scmp.ne.s32.totalorder %s1895_s24, 0 }
  0x6b   : > { %512 = sbr.rel (%p943_p4) target bundleno = 114 (0x72), region = 76 }
  0x70   : > { %vm513_vm0 = vcmask 261120   ;;  %v1423_v0 = vmov 0.0  }
  0x71   : > { %514 = vst.msk [vmem:[#allocation2] sm:$0xff] %vm513_vm0, %v1423_v0 }
  0x72 PF: > { %vm519_vm1 = vcmask 261120   ;;  %v550_v1 = vld [vmem:[%s432_s1 + $0x8] sm:$0xff]  ;;  %v549_v3 = vld [vmem:[%s432_s1] sm:$0xff]  ;;  %vm608_vm2 = vcmask 130048   ;;  %vm635_vm3 = vcmask 64512   ;;  %s1896_s19 = sld [smem:[#allocation23_spill]] }
  0x73   : > { %v518_v2 = vld [vmem:[%s422_s13 + $0x8] sm:$0xff]  ;;  %947 = vmatpush.xpose.msk.msra.mxu1 %vm519_vm1, %v550_v1  ;;  %v517_v4 = vld [vmem:[%s422_s13] sm:$0xff] }
  0x74   : > { %944 = vmatpush.xpose.msk.msra.mxu0 %vm519_vm1, %v518_v2  ;;  %v516_v5 = vld [vmem:[%s412_s14] sm:$0xff]  ;;  %v515_v6 = vld [vmem:[%s402_s15] sm:$0xff] }
  0x75   : > { %v581_v9 = vld [vmem:[%s442_s20 + $0x8] sm:$0xff]  ;;  %v580_v10 = vld [vmem:[%s442_s20] sm:$0xff] }
  0x76   : > { %950 = vmatpush.xpose.msk.msra.mxu2 %vm519_vm1, %v581_v9  ;;  %v672_v19 = vld [vmem:[%s452_s23 + $0x8] sm:$0xff]  ;;  %v671_v20 = vld [vmem:[%s452_s23] sm:$0xff] }
  0x77   : > { %948 = vmatpush.xpose.msk.msra.mxu1 %vm519_vm1, %v549_v3 }
  0x78   : > { %945 = vmatpush.xpose.msk.msra.mxu0 %vm519_vm1, %v517_v4  ;;  %v670_v25 = vld [vmem:[#allocation2] sm:$0xff]  ;;  %p957_p7 = scmp.ne.s32.totalorder %s1896_s19, 3 }
  0x79   : > { %s1897_s8 = sld [smem:[#allocation36_spill]] (!%p957_p7) }
  0x7a   : > { %949 = vmatmul.msk.f32.vlgmr.msra.gmra.mxu1 %vm519_vm1, %v516_v5  ;;  %951 = vmatpush.xpose.msk.msra.mxu2 %vm519_vm1, %v580_v10 }
  0x7b   : > { %946 = vmatmul.msk.f32.vlgmr.msra.gmra.mxu0 %vm519_vm1, %v515_v6 }
  0x7c   : > { %690 = vmatpush.msrb.mxu0 %v672_v19 }
  0x7d   : > { %952 = vmatmul.msk.f32.vlgmr.msra.gmra.mxu2 %vm519_vm1, %v516_v5 }
  0x7e   : > { %691 = vmatpush.msrb.mxu0 %v671_v20 }
  0xf7   : > { %v577_v7 = vpop.f32.mrf.mxu1 }
  0xf8   : > { %953 = vmatpush.xpose.msk.msra.mxu3 %vm608_vm2, %v577_v7  ;;  %v546_v8 = vpop.f32.mrf.mxu0 }
  0xfb   : > { %954 = vmatmul.msk.f32.vlgmr.msra.gmra.mxu3 %vm608_vm2, %v546_v8 }
 0x100   : > { %v605_v18 = vpop.f32.mrf.mxu2 }
 0x101   : > { %665 = vmatpush.msrb.mxu3 %v605_v18 }
 0x17e   : > { %v632_v11 = vpop.f32.mrf.mxu3 }
 0x17f   : > { %v636_v12 = vsel %vm635_vm3, %v632_v11, -inf }
 0x180   : > { %637 = vmax.xlane.f32.xlu0 %v636_v12 }
 0x1f3   : > { %v638_v13 = vpop.xlane.xlu0 %637 }
 0x1f4   : > { %v639_v14 = vsub.f32 %v632_v11, %v638_v13 }
 0x1f6   : > { %v640_v15 = vmul.f32 1.442695, %v639_v14 }
 0x1f8   : > { %1096 = vpow2.f32 %v640_v15 }
 0x1fe   : > { %v1097_v16 = vpop.eup %1096 }
 0x1ff   : > { %v642_v17 = vsel %vm635_vm3, %v1097_v16, 0.0 }
 0x200   : > { %643 = vadd.xlane.f32.xlu0 %v642_v17 }
 0x273   : > { %v644_v21 = vpop.xlane.xlu0 %643 }
 0x274   : > { %1098 = vrcp.f32 %v644_v21 }
 0x27a   : > { %v1099_v22 = vpop.eup %1098 }
 0x27b   : > { %v646_v23 = vmul.f32 %v1099_v22, %v1097_v16 }
 0x27d   : > { %955 = vmatmul.msk.f32.vlgmr.msrb.gmra.mxu3 %vm635_vm3, %v646_v23 }
 0x300   : > { %v667_v24 = vpop.f32.mrf.mxu3 }
 0x301   : > { %956 = vmatmul.msk.f32.vlgmr.msrb.gmra.mxu0 %vm608_vm2, %v667_v24 }
 0x37d   : > { %701 = sbr.rel (%p957_p7) target bundleno = 908 (0x38c), region = 80 }
 0x37e   : > { %v693_v26 = vpop.f32.mrf.mxu0 }
 0x37f   : > { %v696_v27 = vadd.f32 %v693_v26, %v670_v25 }
 0x381   : > { %697 = vst.msk [vmem:[#allocation2] sm:$0xff] %vm519_vm1, %v696_v27 }
 0x382   : > { %v1100_v29 = vld [vmem:[%s1897_s8] ss:$0 sm:$0xff] }
 0x388   : > { %v702_v28 = vld [vmem:[#allocation2] sm:$0xff] }
 0x389   : > { %v707_v30 = vadd.f32 %v1100_v29, %v702_v28 }
 0x38b   : > { %708 = vst.msk [vmem:[%s508_s9] sm:$0xff] %vm519_vm1, %v707_v30 }
 0x38c PF: > { %s1898_s22 = sld [smem:[#allocation24_spill]]  ;;  %s722_s25 = sshll.u32 %s508_s9, 4  ;;  %s723_s25 = int_to_ptr.vmem [resolvable:$true] %s722_s25 }
 0x38d   : > { %s1900_s3 = sld [smem:[#allocation37_spill]]  ;;  %s710_s13 = scalar_lea.sflag [#allocation5], %s1706_s11 }
 0x392   : > { %s959_s17 = sshll.u32 %s1898_s22, 3 }
 0x393   : > { %s720_s18 = scalar_lea.hbm %s1900_s3, %s959_s17  ;;  %s1301_s23 = scalar_lea.hbm %s1900_s3, 16 }
 0x394   : > { %s724_s30 = sshll.u32 %s720_s18, 4  ;;  %s725_s30 = int_to_ptr.hbm [resolvable:$true] %s724_s30 }
 0x395   : > { %s1295_s12 = sshra.s32 %s725_s30, 4  ;;  %s1296_s12 = int_to_ptr.hbm [resolvable:$true] %s1295_s12 }
 0x396   : > { %s1297_s1 = scalar_lea.hbm %s1296_s12, 8  ;;  %p1302_p5 = scmp.lt.s32.totalorder %s1296_s12, %s1900_s3 }
 0x397   : > { %p1298_p12 = scmp.ne.s32.totalorder %s1296_s12, %s1297_s1  ;;  %p1303_p10 = scmp.lt.s32.totalorder %s1301_s23, %s1297_s1 }
 0x399   : > { %p1299_p13 = pnand %p1298_p12, %p1587_p8  ;;  %p1304_p1 = por %p1303_p10, %p1302_p5 }
 0x39b   : > { %p1300_p0 = pneg %p1299_p13 }
 0x39d   : > { %p1305_p6 = pnand %p1304_p1, %p1300_p0 }
 0x39f   : > { %1308 = shalt.err (!%p1305_p6)
}
 0x3a0   : > { %978 = dma.vmem_to_hbm [thread:$0]  (%p1587_p8), %s723_s25, 128, %s725_s30, %s710_s13  }
 0x3a1 PF: > { %s1901_s11 = sld [smem:[#allocation26_spill]] }
 0x3a2   : > { %s1902_s27 = sld [smem:[#allocation22_spill]] }
 0x3a7   : > { %p1004_p3 = scmp.ge.s32.totalorder %s1901_s11, 2 }
 0x3a8   : > { %s736_s16 = sand.u32 1, %s1902_s27  }
 0x3a9   : > { %p1000_p9 = pnand %p1004_p3, %p1594_p2  ;;  %s737_s21 = scalar_lea.sflag [#allocation5], %s736_s16 }
 0x3ab   : > { %p1001_p11 = pneg %p1000_p9 }
 0x3ad   : > { %1374 = dma.done.wait (%p1001_p11), %s737_s21, 128  }
 0x3ae   : > { %1376 = vsyncadd (%p1001_p11), %s737_s21, 4294967168  ;;  %s32_s11 = sadd.s32 1, %s1901_s11   ;;  %s1904_s24 = sld [smem:[#allocation21_spill]] }
 0x3af   : > { %p29_p4 = scmp.ge.s32.totalorder %s32_s11, 10   ;;  %s1905_s8 = sld [smem:[#allocation29_spill]] }
 0x3b0   : > { %s1906_s22 = sld [smem:[#allocation30_spill]]  ;;  %s1910_s25 = smov %s1387_s26 }
 0x3b1   : > { %s1907_s30 = sld [smem:[#allocation25_spill]]  ;;  %s1912_s27 = smov %s1395_s28 }
 0x3b2   : > { %s1908_s9 = sld [smem:[#allocation27_spill]]  ;;  %s1913_s28 = smov %s1399_s29 }
 0x3b3   : > { %s1909_s15 = sld [smem:[#allocation28_spill]] }
 0x3b5   : > { %s1911_s26 = smov %s1905_s8  ;;  %s1915_s8 = smov %s1415_s10 }
 0x3b6   : > { %s1914_s29 = smov %s1906_s22  ;;  %31 = sbr.rel (!%p29_p4) target bundleno = 20 (0x14), region = 162 }
 0x3b9   : > { %s1916_s10 = smov %s1909_s15 }
 0x3bb   :  { %743 = vsyncpa [#allocation4], 1 }
 0x3bc   :  { %745 = vsyncpa [#allocation4 + $0x1], 1 }
 0x3bd   :  { %746 = vsyncpa [#allocation7], 1 }
 0x3be   :  { %748 = vsyncpa [#allocation7 + $0x1], 1 }
 0x3bf   :  { %749 = vsyncpa [#allocation10], 1 }
 0x3c0   :  { %751 = vsyncpa [#allocation10 + $0x1], 1 }
 0x3c1   :  { %752 = vsyncpa [#allocation13], 1 }
 0x3c2   :  { %754 = vsyncpa [#allocation13 + $0x1], 1 }
 0x3c3   :  { %755 = vsyncpa [#allocation5], 1 }
 0x3c4   :  { %757 = vsyncpa [#allocation5 + $0x1], 1 }

</bundles_post_ra>
